<compile_context>
chip_gen: v7x
topology: tpu7x:2x2x1
jax: 0.10.0
libtpu: 0.0.40
codegen_flags: <defaults>
</compile_context>

<pallas_src>
import functools

import jax
import jax.numpy as jnp
from jax.experimental import pallas as pl
from jax.experimental.pallas import tpu as pltpu

_LANE = 128
_SUBLANE = 8


def _round_up(x, m):
  return ((x + m - 1) // m) * m


# ---------------------------------------------------------------------------
# Kernel
# ---------------------------------------------------------------------------
def _adaptive_attn_kernel(
    pooled_ref, local_ref,          # (bb, tn, Cp), (bb, tn, Cl)
    wp_ref, bp_ref,                 # (Cp, Cp+2), (Cp+2, 1)
    wl_ref, bl_ref,                 # (Cl, Cl+2), (Cl+2, 1)
    pooled_out_ref, local_out_ref,  # (bb, Cp, tn), (bb, Cl, tn)
):
  bb, tn, Cp = pooled_ref.shape
  Cl = local_ref.shape[-1]
  rows = bb * tn

  # Collapse the packed batch dim into rows (layout-preserving reshape) so each
  # stream does ONE fused matmul per tile: conv(+BN) columns and the composed
  # fc3 gate-logit columns ride the same MXU push.
  p = pooled_ref[...].reshape(rows, Cp)
  l = local_ref[...].reshape(rows, Cl)

  pz = jnp.dot(p, wp_ref[...], preferred_element_type=jnp.float32)  # (rows, Cp+2)
  lz = jnp.dot(l, wl_ref[...], preferred_element_type=jnp.float32)  # (rows, Cl+2)

  # Transpose first (one 2-D XLU transpose per stream), then run the whole
  # elementwise epilogue lane-dense along the row axis.  The per-row gate is a
  # (1, rows) slice that broadcasts along sublanes (cheap).
  pzT = pz.T + bp_ref[...]          # (Cp+2, rows)
  lzT = lz.T + bl_ref[...]          # (Cl+2, rows)

  gates = jax.nn.sigmoid(pzT[Cp:, :] + lzT[Cl:, :])   # (2, rows)
  pooled_w = gates[0:1, :]
  local_w = gates[1:2, :]

  pc = (jnp.maximum(pzT[:Cp, :], 0.0) * pooled_w).astype(pooled_out_ref.dtype)
  lc = (jnp.maximum(lzT[:Cl, :], 0.0) * local_w).astype(local_out_ref.dtype)

  # Column b*tn + n of pc/lc belongs to packed batch element b, point n.
  # bb is static, so this unrolls; for the large-N path bb == 1 and this is a
  # single full-tile, lane-dense store.
  for b in range(bb):
    pooled_out_ref[b] = pc[:, b * tn:(b + 1) * tn]
    local_out_ref[b] = lc[:, b * tn:(b + 1) * tn]


# ---------------------------------------------------------------------------
# Tiling choice
# ---------------------------------------------------------------------------
def _choose_tiling(B, N, target_rows):
  """Pick (bb, tn) with bb*tn ~= target_rows rows per grid step.

  Exactly one of two regimes:
    * N >= 256: tile along N (bb = 1, tn a multiple of 128); wrapper zero-pads N
      to a multiple of tn, so the tile is always bounded (no whole-N fallback).
    * small N : pack several whole batch elements per step (tn = N, bb > 1);
      wrapper zero-pads B to a multiple of bb.
  """
  target_rows = max(_LANE, (target_rows // _LANE) * _LANE)
  if N >= 2 * _LANE:
    bb = 1
    tn = min(target_rows, _round_up(N, _LANE))
    # v7x has two TensorCores: make sure the ("parallel","parallel") grid has
    # at least 2 steps whenever the tile is large enough to split.
    if B * (_round_up(N, tn) // tn) < 2 and tn >= 2 * _LANE:
      tn = _round_up(tn // 2, _LANE)
  else:
    tn = N
    # Cap bb so the unrolled per-batch store loop in the kernel stays small.
    bb = max(1, min(B, target_rows // max(N, 1), 64))
  return bb, tn


# ---------------------------------------------------------------------------
# Wrapper
# ---------------------------------------------------------------------------
@functools.partial(jax.jit, static_argnames=("target_rows",))
def adaptive_attention_forward(pooled_features, local_features, params, *,
                               target_rows=2048):
  """pooled_features: (B, N, Cp), local_features: (B, N, Cl) -> (B, Cp, N), (B, Cl, N)."""
  B, N, Cp = pooled_features.shape
  _, _, Cl = local_features.shape
  out_p_dtype = pooled_features.dtype
  out_l_dtype = local_features.dtype

  bb, tn = _choose_tiling(B, N, target_rows)
  B_pad = _round_up(B, bb)
  N_pad = _round_up(N, tn)
  grid = (B_pad // bb, N_pad // tn)

  if B_pad != B or N_pad != N:
    pad = ((0, B_pad - B), (0, N_pad - N), (0, 0))
    pooled_features = jnp.pad(pooled_features, pad)
    local_features = jnp.pad(local_features, pad)

  # Matmul operands follow the activation dtype (bf16 activations feed the MXU
  # directly); accumulation stays f32; biases are added in f32 post-transpose.
  wp = params["wp"].astype(out_p_dtype)
  wl = params["wl"].astype(out_l_dtype)
  bp = params["bp"].astype(jnp.float32)
  bl = params["bl"].astype(jnp.float32)

  def rep(shape):
    return pl.BlockSpec(shape, lambda i, j: (0,) * len(shape))

  in_specs = [
      pl.BlockSpec((bb, tn, Cp), lambda i, j: (i, j, 0)),
      pl.BlockSpec((bb, tn, Cl), lambda i, j: (i, j, 0)),
      rep(wp.shape), rep(bp.shape),
      rep(wl.shape), rep(bl.shape),
  ]
  out_specs = [
      pl.BlockSpec((bb, Cp, tn), lambda i, j: (i, 0, j)),
      pl.BlockSpec((bb, Cl, tn), lambda i, j: (i, 0, j)),
  ]
  out_shape = [
      jax.ShapeDtypeStruct((B_pad, Cp, N_pad), out_p_dtype),
      jax.ShapeDtypeStruct((B_pad, Cl, N_pad), out_l_dtype),
  ]

  # VMEM budget: double-buffered input blocks (Cp/Cl lane-pad to 128) + output
  # blocks + margin for weights/intermediates.  Kept well under v7x's 64 MiB
  # physical VMEM while raising the smaller scoped defaults where useful.
  rows = bb * tn
  in_bytes = rows * (_round_up(Cp, _LANE) + _round_up(Cl, _LANE)) * \
      pooled_features.dtype.itemsize
  out_bytes = bb * (_round_up(Cp, _SUBLANE) + _round_up(Cl, _SUBLANE)) * \
      _round_up(tn, _LANE) * jnp.dtype(out_p_dtype).itemsize
  vmem_limit = int(min(max(32 << 20, 2 * (in_bytes + out_bytes) + (8 << 20)),
                       56 << 20))

  pooled_out, local_out = pl.pallas_call(
      _adaptive_attn_kernel,
      out_shape=out_shape,
      grid=grid,
      in_specs=in_specs,
      out_specs=out_specs,
      compiler_params=pltpu.CompilerParams(
          dimension_semantics=("parallel", "parallel"),
          vmem_limit_bytes=vmem_limit),
  )(pooled_features, local_features, wp, bp, wl, bl)

  return pooled_out[:B, :, :N], local_out[:B, :, :N]


# ---------------------------------------------------------------------------
# Parameters (PyTorch-shaped) + folding
# ---------------------------------------------------------------------------
def make_raw_params(key, pooled_input, local_input, middle):
  """Deterministic synthetic parameters in PyTorch layout."""
  Cp, Cl, mid = pooled_input, local_input, middle
  ks = jax.random.split(key, 18)

  def lin(kw, kb, fan_in, fan_out):
    w = jax.random.normal(kw, (fan_out, fan_in), jnp.float32) * 0.1
    b = jax.random.normal(kb, (fan_out,), jnp.float32) * 0.1
    return w, b

  w1, b1 = lin(ks[0], ks[1], Cp, mid)          # fc1
  w2, b2 = lin(ks[2], ks[3], Cl, mid)          # fc2
  w3, b3 = lin(ks[4], ks[5], 2 * mid, 2)       # fc3 (Linear part; Sigmoid in kernel)
  wc1, bc1 = lin(ks[6], ks[7], Cp, Cp)         # conv1 (1x1)
  wc2, bc2 = lin(ks[8], ks[9], Cl, Cl)         # conv2 (1x1)
  g1 = jax.random.uniform(ks[10], (Cp,), jnp.float32, 0.5, 1.5)
  be1 = jax.random.normal(ks[11], (Cp,), jnp.float32) * 0.1
  m1 = jax.random.normal(ks[12], (Cp,), jnp.float32) * 0.1
  v1 = jax.random.uniform(ks[13], (Cp,), jnp.float32, 0.5, 1.5)
  g2 = jax.random.uniform(ks[14], (Cl,), jnp.float32, 0.5, 1.5)
  be2 = jax.random.normal(ks[15], (Cl,), jnp.float32) * 0.1
  m2 = jax.random.normal(ks[16], (Cl,), jnp.float32) * 0.1
  v2 = jax.random.uniform(ks[17], (Cl,), jnp.float32, 0.5, 1.5)
  return dict(w1=w1, b1=b1, w2=w2, b2=b2, w3=w3, b3=b3,
              wc1=wc1, bc1=bc1, g1=g1, be1=be1, m1=m1, v1=v1,
              wc2=wc2, bc2=bc2, g2=g2, be2=be2, m2=m2, v2=v2)


def fold_params(raw, eps=1e-5):
  """Fold fc1/fc2∘fc3 and eval-mode BN into two fused weight matrices."""
  w1, b1, w2, b2, w3, b3 = raw["w1"], raw["b1"], raw["w2"], raw["b2"], raw["w3"], raw["b3"]
  mid = w1.shape[0]

  # logits = pf @ w3[:, :mid].T + lf @ w3[:, mid:].T + b3, with pf = p@w1.T+b1 etc.
  # (valid: the module has no nonlinearity between fc1/fc2 and fc3.)
  w3p, w3l = w3[:, :mid], w3[:, mid:]
  w3p_eff = w1.T @ w3p.T                                  # (Cp, 2)
  w3l_eff = w2.T @ w3l.T                                  # (Cl, 2)
  b3_eff = b1 @ w3p.T + b2 @ w3l.T + b3                   # (2,)

  # eval-mode BN folded into the 1x1 convs.
  s1 = raw["g1"] / jnp.sqrt(raw["v1"] + eps)
  s2 = raw["g2"] / jnp.sqrt(raw["v2"] + eps)
  wc1_eff = (raw["wc1"] * s1[:, None]).T                  # (Cp_in, Cp_out)
  bc1_eff = s1 * (raw["bc1"] - raw["m1"]) + raw["be1"]
  wc2_eff = (raw["wc2"] * s2[:, None]).T
  bc2_eff = s2 * (raw["bc2"] - raw["m2"]) + raw["be2"]

  wp = jnp.concatenate([wc1_eff, w3p_eff], axis=1)        # (Cp, Cp+2)
  bp = jnp.concatenate([bc1_eff, b3_eff], axis=0)[:, None]       # (Cp+2, 1)
  wl = jnp.concatenate([wc2_eff, w3l_eff], axis=1)        # (Cl, Cl+2)
  bl = jnp.concatenate([bc2_eff, jnp.zeros((2,), jnp.float32)], axis=0)[:, None]
  return dict(wp=wp, bp=bp, wl=wl, bl=bl)


# ---------------------------------------------------------------------------
# Pure-JAX reference mirroring the PyTorch forward (eval-mode BN)
# ---------------------------------------------------------------------------
def reference_forward(pooled_features, local_features, raw, eps=1e-5):
  B, N, Cp = pooled_features.shape
  Cl = local_features.shape[-1]
  pd = pooled_features.reshape(-1, Cp)
  ld = local_features.reshape(-1, Cl)

  pf = pd @ raw["w1"].T + raw["b1"]
  lf = ld @ raw["w2"].T + raw["b2"]
  cat = jnp.concatenate([pf, lf], axis=-1)
  gates = jax.nn.sigmoid(cat @ raw["w3"].T + raw["b3"])
  pw = gates[:, 0].reshape(B, 1, N)
  lw = gates[:, 1].reshape(B, 1, N)

  def conv_bn_relu(xd, wc, bc, g, be, m, v, C):
    y = xd @ wc.T + bc
    y = g * (y - m) / jnp.sqrt(v + eps) + be
    y = jnp.maximum(y, 0.0)
    return y.reshape(B, N, C).transpose(0, 2, 1)

  pc = conv_bn_relu(pd, raw["wc1"], raw["bc1"], raw["g1"], raw["be1"],
                    raw["m1"], raw["v1"], Cp)
  lc = conv_bn_relu(ld, raw["wc2"], raw["bc2"], raw["g2"], raw["be2"],
                    raw["m2"], raw["v2"], Cl)
  return pc * pw, lc * lw


# ---------------------------------------------------------------------------
# Demo / correctness check
# ---------------------------------------------------------------------------
if __name__ == "__main__":
  pooled_input, local_input, middle = 32, 16, 32
  key = jax.random.PRNGKey(0)
  k_pool, k_loc, k_par, k_pool2, k_loc2 = jax.random.split(key, 5)

  raw = make_raw_params(k_par, pooled_input, local_input, middle)
  params = fold_params(raw)

  # --- Small-N regime (batch-packing path): B=2, N=16 -----------------------
  B, N = 2, 16
  pooled = jax.random.normal(k_pool, (B, N, pooled_input), jnp.float32)
  local = jax.random.normal(k_loc, (B, N, local_input), jnp.float32)

  out_p, out_l = adaptive_attention_forward(pooled, local, params)
  jax.block_until_ready((out_p, out_l))
  ref_p, ref_l = reference_forward(pooled, local, raw)
  assert out_p.shape == (B, pooled_input, N)
  assert out_l.shape == (B, local_input, N)
  assert jnp.allclose(out_p, ref_p, atol=1e-4, rtol=1e-4)
  assert jnp.allclose(out_l, ref_l, atol=1e-4, rtol=1e-4)

  # --- Large-N regime (N tiling, padding, >=2-step grid): B=1, N=600 --------
  B2, N2 = 1, 600
  pooled2 = jax.random.normal(k_pool2, (B2, N2, pooled_input), jnp.float32)
  local2 = jax.random.normal(k_loc2, (B2, N2, local_input), jnp.float32)

  out_p2, out_l2 = adaptive_attention_forward(pooled2, local2, params)
  jax.block_until_ready((out_p2, out_l2))
  ref_p2, ref_l2 = reference_forward(pooled2, local2, raw)
  assert out_p2.shape == (B2, pooled_input, N2)
  assert out_l2.shape == (B2, local_input, N2)
  assert jnp.allclose(out_p2, ref_p2, atol=1e-4, rtol=1e-4)
  assert jnp.allclose(out_l2, ref_l2, atol=1e-4, rtol=1e-4)

  print("KERNEL_OK")
</pallas_src>

<mosaic_0001>
module attributes {stable_mosaic.version = 11 : i64} {
  func.func @_adaptive_attn_kernel(%arg0: i32, %arg1: i32, %arg2: memref<2x16x32xf32, #tpu.memory_space<vmem>>, %arg3: memref<2x16x16xf32, #tpu.memory_space<vmem>>, %arg4: memref<32x34xf32, #tpu.memory_space<vmem>>, %arg5: memref<34x1xf32, #tpu.memory_space<vmem>>, %arg6: memref<16x18xf32, #tpu.memory_space<vmem>>, %arg7: memref<18x1xf32, #tpu.memory_space<vmem>>, %arg8: memref<2x32x16xf32, #tpu.memory_space<vmem>>, %arg9: memref<2x16x16xf32, #tpu.memory_space<vmem>>) attributes {dimension_semantics = [#tpu.dimension_semantics<parallel>, #tpu.dimension_semantics<parallel>], iteration_bounds = array<i64: 1, 1>, scalar_prefetch = 0 : i64, scratch_operands = 0 : i64, tpu.core_type = #tpu.core_type<tc>, window_params = [{transform_indices = @transform_0, window_bounds = array<i64: 2, 16, 32>}, {transform_indices = @transform_1, window_bounds = array<i64: 2, 16, 16>}, {pipeline_mode = #tpu.pipeline_mode<synchronous>, transform_indices = @transform_2, window_bounds = array<i64: 32, 34>}, {pipeline_mode = #tpu.pipeline_mode<synchronous>, transform_indices = @transform_3, window_bounds = array<i64: 34, 1>}, {pipeline_mode = #tpu.pipeline_mode<synchronous>, transform_indices = @transform_4, window_bounds = array<i64: 16, 18>}, {pipeline_mode = #tpu.pipeline_mode<synchronous>, transform_indices = @transform_5, window_bounds = array<i64: 18, 1>}, {transform_indices = @transform_6, window_bounds = array<i64: 2, 32, 16>}, {transform_indices = @transform_7, window_bounds = array<i64: 2, 16, 16>}]} {
    %c0 = arith.constant 0 : index
    %c0_0 = arith.constant 0 : index
    %c0_1 = arith.constant 0 : index
    %0 = vector.load %arg2[%c0, %c0_0, %c0_1] : memref<2x16x32xf32, #tpu.memory_space<vmem>>, vector<2x16x32xf32>
    %1 = vector.shape_cast %0 : vector<2x16x32xf32> to vector<32x32xf32>
    %c0_2 = arith.constant 0 : index
    %c0_3 = arith.constant 0 : index
    %c0_4 = arith.constant 0 : index
    %2 = vector.load %arg3[%c0_2, %c0_3, %c0_4] : memref<2x16x16xf32, #tpu.memory_space<vmem>>, vector<2x16x16xf32>
    %3 = vector.shape_cast %2 : vector<2x16x16xf32> to vector<32x16xf32>
    %c0_5 = arith.constant 0 : index
    %c0_6 = arith.constant 0 : index
    %4 = vector.load %arg4[%c0_5, %c0_6] : memref<32x34xf32, #tpu.memory_space<vmem>>, vector<32x34xf32>
    %cst = arith.constant dense<0.000000e+00> : vector<32x34xf32>
    %5 = tpu.matmul %1, %4, %cst {dimension_numbers = #tpu.dot_dimension_numbers<[1], [0], [0], [1], [0, 0, 1, 1], [], []>} : vector<32x32xf32>, vector<32x34xf32>, vector<32x34xf32> -> vector<32x34xf32>
    %c0_7 = arith.constant 0 : index
    %c0_8 = arith.constant 0 : index
    %6 = vector.load %arg6[%c0_7, %c0_8] : memref<16x18xf32, #tpu.memory_space<vmem>>, vector<16x18xf32>
    %cst_9 = arith.constant dense<0.000000e+00> : vector<32x18xf32>
    %7 = tpu.matmul %3, %6, %cst_9 {dimension_numbers = #tpu.dot_dimension_numbers<[1], [0], [0], [1], [0, 0, 1, 1], [], []>} : vector<32x16xf32>, vector<16x18xf32>, vector<32x18xf32> -> vector<32x18xf32>
    %8 = tpu.transpose %5, [1, 0] : vector<32x34xf32> -> vector<34x32xf32>
    %c0_10 = arith.constant 0 : index
    %c0_11 = arith.constant 0 : index
    %9 = vector.load %arg5[%c0_10, %c0_11] : memref<34x1xf32, #tpu.memory_space<vmem>>, vector<34x1xf32>
    %10 = vector.broadcast %9 : vector<34x1xf32> to vector<34x32xf32>
    %11 = arith.addf %8, %10 : vector<34x32xf32>
    %12 = tpu.transpose %7, [1, 0] : vector<32x18xf32> -> vector<18x32xf32>
    %c0_12 = arith.constant 0 : index
    %c0_13 = arith.constant 0 : index
    %13 = vector.load %arg7[%c0_12, %c0_13] : memref<18x1xf32, #tpu.memory_space<vmem>>, vector<18x1xf32>
    %14 = vector.broadcast %13 : vector<18x1xf32> to vector<18x32xf32>
    %15 = arith.addf %12, %14 : vector<18x32xf32>
    %16 = vector.extract_strided_slice %11 {offsets = [32, 0], sizes = [2, 32], strides = [1, 1]} : vector<34x32xf32> to vector<2x32xf32>
    %17 = vector.extract_strided_slice %15 {offsets = [16, 0], sizes = [2, 32], strides = [1, 1]} : vector<18x32xf32> to vector<2x32xf32>
    %18 = arith.addf %16, %17 : vector<2x32xf32>
    %19 = arith.negf %18 : vector<2x32xf32>
    %20 = math.exp %19 : vector<2x32xf32>
    %cst_14 = arith.constant 1.000000e+00 : f32
    %21 = vector.broadcast %cst_14 : f32 to vector<2x32xf32>
    %22 = arith.addf %21, %20 : vector<2x32xf32>
    %23 = arith.divf %21, %22 : vector<2x32xf32>
    %24 = vector.extract_strided_slice %23 {offsets = [0, 0], sizes = [1, 32], strides = [1, 1]} : vector<2x32xf32> to vector<1x32xf32>
    %25 = vector.extract_strided_slice %23 {offsets = [1, 0], sizes = [1, 32], strides = [1, 1]} : vector<2x32xf32> to vector<1x32xf32>
    %26 = vector.extract_strided_slice %11 {offsets = [0, 0], sizes = [32, 32], strides = [1, 1]} : vector<34x32xf32> to vector<32x32xf32>
    %cst_15 = arith.constant 0.000000e+00 : f32
    %27 = vector.broadcast %cst_15 : f32 to vector<32x32xf32>
    %28 = arith.maximumf %26, %27 : vector<32x32xf32>
    %29 = vector.broadcast %24 : vector<1x32xf32> to vector<32x32xf32>
    %30 = arith.mulf %28, %29 : vector<32x32xf32>
    %31 = vector.extract_strided_slice %15 {offsets = [0, 0], sizes = [16, 32], strides = [1, 1]} : vector<18x32xf32> to vector<16x32xf32>
    %cst_16 = arith.constant 0.000000e+00 : f32
    %32 = vector.broadcast %cst_16 : f32 to vector<16x32xf32>
    %33 = arith.maximumf %31, %32 : vector<16x32xf32>
    %34 = vector.broadcast %25 : vector<1x32xf32> to vector<16x32xf32>
    %35 = arith.mulf %33, %34 : vector<16x32xf32>
    %36 = vector.extract_strided_slice %30 {offsets = [0, 0], sizes = [32, 16], strides = [1, 1]} : vector<32x32xf32> to vector<32x16xf32>
    %c0_17 = arith.constant 0 : index
    %c0_18 = arith.constant 0 : index
    %c0_19 = arith.constant 0 : index
    %37 = vector.load %arg8[%c0_17, %c0_18, %c0_19] : memref<2x32x16xf32, #tpu.memory_space<vmem>>, vector<1x32x16xf32>
    %38 = vector.shape_cast %37 : vector<1x32x16xf32> to vector<32x16xf32>
    %39 = vector.shape_cast %36 : vector<32x16xf32> to vector<1x32x16xf32>
    tpu.vector_store %arg8[%c0_17, %c0_18, %c0_19], %39 {strides = array<i32>} : memref<2x32x16xf32, #tpu.memory_space<vmem>>, vector<1x32x16xf32>,
    %40 = vector.extract_strided_slice %35 {offsets = [0, 0], sizes = [16, 16], strides = [1, 1]} : vector<16x32xf32> to vector<16x16xf32>
    %c0_20 = arith.constant 0 : index
    %c0_21 = arith.constant 0 : index
    %c0_22 = arith.constant 0 : index
    %41 = vector.load %arg9[%c0_20, %c0_21, %c0_22] : memref<2x16x16xf32, #tpu.memory_space<vmem>>, vector<1x16x16xf32>
    %42 = vector.shape_cast %41 : vector<1x16x16xf32> to vector<16x16xf32>
    %43 = vector.shape_cast %40 : vector<16x16xf32> to vector<1x16x16xf32>
    tpu.vector_store %arg9[%c0_20, %c0_21, %c0_22], %43 {strides = array<i32>} : memref<2x16x16xf32, #tpu.memory_space<vmem>>, vector<1x16x16xf32>,
    %44 = vector.extract_strided_slice %30 {offsets = [0, 16], sizes = [32, 16], strides = [1, 1]} : vector<32x32xf32> to vector<32x16xf32>
    %c1 = arith.constant 1 : index
    %c0_23 = arith.constant 0 : index
    %c0_24 = arith.constant 0 : index
    %45 = vector.load %arg8[%c1, %c0_23, %c0_24] : memref<2x32x16xf32, #tpu.memory_space<vmem>>, vector<1x32x16xf32>
    %46 = vector.shape_cast %45 : vector<1x32x16xf32> to vector<32x16xf32>
    %47 = vector.shape_cast %44 : vector<32x16xf32> to vector<1x32x16xf32>
    tpu.vector_store %arg8[%c1, %c0_23, %c0_24], %47 {strides = array<i32>} : memref<2x32x16xf32, #tpu.memory_space<vmem>>, vector<1x32x16xf32>,
    %48 = vector.extract_strided_slice %35 {offsets = [0, 16], sizes = [16, 16], strides = [1, 1]} : vector<16x32xf32> to vector<16x16xf32>
    %c1_25 = arith.constant 1 : index
    %c0_26 = arith.constant 0 : index
    %c0_27 = arith.constant 0 : index
    %49 = vector.load %arg9[%c1_25, %c0_26, %c0_27] : memref<2x16x16xf32, #tpu.memory_space<vmem>>, vector<1x16x16xf32>
    %50 = vector.shape_cast %49 : vector<1x16x16xf32> to vector<16x16xf32>
    %51 = vector.shape_cast %48 : vector<16x16xf32> to vector<1x16x16xf32>
    tpu.vector_store %arg9[%c1_25, %c0_26, %c0_27], %51 {strides = array<i32>} : memref<2x16x16xf32, #tpu.memory_space<vmem>>, vector<1x16x16xf32>,
    return
  }
  func.func @transform_0(%arg0: i32, %arg1: i32) -> (i32, i32, i32) {
    %c0_i32 = arith.constant 0 : i32
    %c0_i32_0 = arith.constant 0 : i32
    return %arg0, %arg1, %c0_i32 : i32, i32, i32
  }
  func.func @transform_1(%arg0: i32, %arg1: i32) -> (i32, i32, i32) {
    %c0_i32 = arith.constant 0 : i32
    %c0_i32_0 = arith.constant 0 : i32
    return %arg0, %arg1, %c0_i32 : i32, i32, i32
  }
  func.func @transform_2(%arg0: i32, %arg1: i32) -> (i32, i32) {
    %c0_i32 = arith.constant 0 : i32
    %c0_i32_0 = arith.constant 0 : i32
    %c0_i32_1 = arith.constant 0 : i32
    return %c0_i32, %c0_i32_0 : i32, i32
  }
  func.func @transform_3(%arg0: i32, %arg1: i32) -> (i32, i32) {
    %c0_i32 = arith.constant 0 : i32
    %c0_i32_0 = arith.constant 0 : i32
    %c0_i32_1 = arith.constant 0 : i32
    return %c0_i32, %c0_i32_0 : i32, i32
  }
  func.func @transform_4(%arg0: i32, %arg1: i32) -> (i32, i32) {
    %c0_i32 = arith.constant 0 : i32
    %c0_i32_0 = arith.constant 0 : i32
    %c0_i32_1 = arith.constant 0 : i32
    return %c0_i32, %c0_i32_0 : i32, i32
  }
  func.func @transform_5(%arg0: i32, %arg1: i32) -> (i32, i32) {
    %c0_i32 = arith.constant 0 : i32
    %c0_i32_0 = arith.constant 0 : i32
    %c0_i32_1 = arith.constant 0 : i32
    return %c0_i32, %c0_i32_0 : i32, i32
  }
  func.func @transform_6(%arg0: i32, %arg1: i32) -> (i32, i32, i32) {
    %c0_i32 = arith.constant 0 : i32
    %c0_i32_0 = arith.constant 0 : i32
    return %arg0, %c0_i32, %arg1 : i32, i32, i32
  }
  func.func @transform_7(%arg0: i32, %arg1: i32) -> (i32, i32, i32) {
    %c0_i32 = arith.constant 0 : i32
    %c0_i32_0 = arith.constant 0 : i32
    return %arg0, %c0_i32, %arg1 : i32, i32, i32
  }
}

</mosaic_0001>

<bundles_post_ra>
// kernel: adaptive_attention_forward.1
= control target key start
LH: loop header
LB: loop body
LE: loop exit
PB: predicated region body
PF: predicated region fallthrough
CT: control target
= control target key end

     0   :  { %13 = vsyncpa [#allocation3], 0  ;;  %s754_s0 = inlined_call_operand.vmem [shape: f32[2,16,32], index: 0, kind: input, shape index: {}]   ;;  %s755_s1 = inlined_call_operand.vmem [shape: f32[2,16,16], index: 1, kind: input, shape index: {}]   ;;  %s756_s2 = inlined_call_operand.hbm [shape: f32[32,34], index: 2, kind: input, shape index: {}]   ;;  %s757_s3 = inlined_call_operand.vmem [shape: f32[34,1], index: 3, kind: input, shape index: {}]   ;;  %s758_s4 = inlined_call_operand.vmem [shape: f32[16,18], index: 4, kind: input, shape index: {}]   ;;  %s759_s5 = inlined_call_operand.vmem [shape: f32[18,1], index: 5, kind: input, shape index: {}]   ;;  %s760_s6 = inlined_call_operand.vmem [shape: f32[2,32,16], index: 6, kind: output, shape index: {0}]   ;;  %s761_s7 = inlined_call_operand.hbm [shape: f32[2,16,16], index: 7, kind: output, shape index: {1}]  }
   0x1   :  { %14 = vsyncpa [#allocation4], 0  ;;  %s580_s24 = smov [#allocation2]   ;;  %s532_s28 = scalar_lea.hbm %s756_s2, 512 }
   0x2   :  { %s24_s25 = sshll.u32 %s580_s24, 4  ;;  %p533_p0 = scmp.ne.s32.totalorder %s756_s2, %s532_s28  ;;  %s25_s25 = int_to_ptr.vmem [resolvable:$true] %s24_s25 }
   0x3   :  { %p536_p1 = scmp.lt.u32.totalorder %s532_s28, %s756_s2 }
   0x5   :  { %p538_p2 = pnand %p536_p1, %p533_p0 }
   0x7   :  { %541 = shalt.err (!%p538_p2)
}
   0x8   :  { %s542_s10 = scalar_lea.vmem %s25_s25, 512  ;;  %p547_p4 = scmp.lt.s32.totalorder %s25_s25, %s25_s25 }
   0x9   :  { %p543_p3 = scmp.ne.s32.totalorder %s25_s25, %s542_s10  ;;  %p548_p5 = scmp.lt.s32.totalorder %s542_s10, %s542_s10 }
   0xb   :  { %p549_p6 = por %p548_p5, %p547_p4 }
   0xd   :  { %p550_p7 = pnand %p549_p6, %p543_p3 }
   0xf   :  { %553 = shalt.err (!%p550_p7)
}
  0x10   :  { %s581_s11 = smov 128   ;;  %s582_s12 = smov 8  }
  0x11   :  { %30 = dma.hbm_to_vmem [thread:$0]  %s756_s2, 512, %s25_s25, [#allocation3], %s581_s11, %s581_s11, %s582_s12  }
  0x12   :  { %576 = dma.done.wait [#allocation3], 512  }
  0x13   :  { %577 = vsyncadd [#allocation3], 4294966784  ;;  %v583_v0 = vmov 0   ;;  %vm152_vm0 = vcmask 130048   ;;  %v48_v1 = vld [vmem:[#allocation2] sm:$0xff]  ;;  %v49_v2 = vld [vmem:[#allocation2 + $0x8] sm:$0xff]  ;;  %v381_v54 = vlaneseq }
  0x14   :  { %527 = vset.pattern.permute.xlu1 %v583_v0  ;;  %526 = vset.pattern.permute.xlu0 %v583_v0  ;;  %v150_v3 = vld [vmem:[%s758_s4] sm:$0xff]  ;;  %vm52_vm1 = vcmask 261120   ;;  %v507_v4 = vpack.c.bf16 %v49_v2, %v48_v1  ;;  %v151_v5 = vld [vmem:[%s758_s4 + $0x8] sm:$0xff]  ;;  %v50_v7 = vld [vmem:[#allocation2 + $0x10] sm:$0xff]  ;;  %s585_s8 = smov [#allocation5]  }
  0x15   :  { %v44_v6 = vld [vmem:[%s755_s1] sm:$0xff]  ;;  %v515_v8 = vpack.c.bf16 %v151_v5, %v150_v3  ;;  %v51_v9 = vld [vmem:[#allocation2 + $0x18] sm:$0xff]  ;;  %v45_v13 = vld [vmem:[%s755_s1 + $0x8] sm:$0xff]  ;;  %v382_v55 = vshrl.u32 %v381_v54, 7  ;;  %s442_s9 = sshll.u32 %s585_s8, 4  ;;  %s443_s9 = int_to_ptr.vmem [resolvable:$true] %s442_s9 }
  0x16   :  { %501 = vmatprep.mubr.msk.f32.mxu1 %vm152_vm0, %v44_v6  ;;  %v40_v10 = vld [vmem:[%s754_s0] sm:$0xff]  ;;  %508 = vmatprep.subr.bf16.mxu0 %v507_v4  ;;  %v511_v11 = vpack.c.bf16 %v51_v9, %v50_v7  ;;  %v46_v14 = vld [vmem:[%s755_s1 + $0x10] sm:$0xff]  ;;  %v41_v17 = vld [vmem:[%s754_s0 + $0x8] sm:$0xff]  ;;  %s554_s10 = scalar_lea.vmem %s443_s9, 512  ;;  %p559_p9 = scmp.lt.s32.totalorder %s443_s9, %s443_s9 }
  0x17   :  { %491 = vmatprep.mubr.msk.f32.mxu0 %vm52_vm1, %v40_v10  ;;  %516 = vmatprep.subr.bf16.mxu1 %v515_v8  ;;  %v349_v12 = vld [vmem:[%s759_s5] sm:$0xff]  ;;  %v351_v18 = vld [vmem:[%s759_s5 + $0x10] sm:$0x3]  ;;  %v47_v19 = vld [vmem:[%s755_s1 + $0x18] sm:$0xff]  ;;  %v383_v60 = vsub.s32 0, %v382_v55  ;;  %v393_v61 = vsub.s32 1, %v382_v55  ;;  %p555_p8 = scmp.ne.s32.totalorder %s443_s9, %s554_s10  ;;  %p560_p10 = scmp.lt.s32.totalorder %s554_s10, %s554_s10 }
  0x18   :  { %510 = vmatpush3.bf16.msra.mxu0 %v507_v4  ;;  %518 = vmatpush3.bf16.msra.mxu1 %v515_v8  ;;  %v286_v15 = vld [vmem:[%s757_s3 + $0x20] sm:$0x3]  ;;  %v42_v20 = vld [vmem:[%s754_s0 + $0x10] sm:$0xff]  ;;  %v283_v21 = vld [vmem:[%s757_s3 + $0x8] sm:$0xff] }
  0x19   :  { %512 = vmatprep.subr.bf16.mxu0 %v511_v11  ;;  %354 = vperm.xlu1 %527, %v349_v12   ;;  %v282_v16 = vld [vmem:[%s757_s3] sm:$0xff]  ;;  %v43_v22 = vld [vmem:[%s754_s0 + $0x18] sm:$0xff]  ;;  %v284_v23 = vld [vmem:[%s757_s3 + $0x10] sm:$0xff]  ;;  %p561_p11 = por %p560_p10, %p559_p9 }
  0x1a   :  { %309 = vperm.xlu0 %526, %v286_v15   ;;  %v285_v32 = vld [vmem:[%s757_s3 + $0x18] sm:$0xff]  ;;  %v350_v33 = vld [vmem:[%s759_s5 + $0x8] sm:$0xff]  ;;  %s584_s3 = smov 112  }
  0x1b   :  { %502 = vmatmul.mubr.msk.f32.vlgmr.msra.gmra.mrb[0].mxu1 %vm152_vm0, %v45_v13  ;;  %p562_p12 = pnand %p561_p11, %p555_p8 }
  0x1c   :  { %514 = vmatpush3.bf16.msra.mxu0 %v511_v11  ;;  %504 = vmatprep.mubr.msk.f32.mxu1 %vm152_vm0, %v46_v14 }
  0x1d   :  { %289 = vperm.xlu1 %527, %v282_v16  }
  0x1e   :  { %364 = vperm.xlu0 %526, %v351_v18  }
  0x1f   :  { %492 = vmatmul.mubr.msk.f32.vlgmr.msra.gmra.mrb[0].mxu0 %vm52_vm1, %v41_v17  ;;  %505 = vmatmul.mubr.msk.f32.gmra.mrb[2].mxu1 %vm152_vm0, %v47_v19 }
  0x20   :  { %494 = vmatprep.mubr.msk.f32.mxu0 %vm52_vm1, %v42_v20 }
  0x21   :  { %294 = vperm.xlu1 %527, %v283_v21  }
  0x23   :  { %495 = vmatmul.mubr.msk.f32.gmra.mrb[2].mxu0 %vm52_vm1, %v43_v22 }
  0x25   :  { %299 = vperm.xlu1 %527, %v284_v23  }
  0x98   :  { %v355_v34 = vpop.permute.xlu1 %354 }
  0x99   :  { %v310_v37 = vpop.permute.xlu0 %309 }
  0x9c   :  { %v290_v35 = vpop.permute.xlu1 %289 }
  0x9d   :  { %v365_v39 = vpop.permute.xlu0 %364 }
  0xa0   :  { %v295_v36 = vpop.permute.xlu1 %294 }
  0xa4   :  { %v300_v38 = vpop.permute.xlu1 %299 }
  0xee   :  { %v503_v24 = vpop.f32.mrb[0].mxu1 }
  0xef   :  { %v231_v25 = vpop.f32.mrb[1].mxu1 }
  0xf0   :  { %317 = vxpose.xlu0.b32.start [1/4] (short) (narrow) %v231_v25, 24 }
  0xf2   :  { %v493_v26 = vpop.f32.mrb[0].mxu0  ;;  %v506_v28 = vpop.f32.mrb[2].mxu1 }
  0xf3   :  { %v131_v27 = vpop.f32.mrb[1].mxu0  ;;  %v241_v29 = vpop.f32.mrb[3].mxu1 }
  0xf4   :  { %250 = vxpose.xlu1.b32.start [1/4] (short) (narrow) %v131_v27, 40  ;;  %318 = vxpose.xlu0.b32.cont [2/4] (short) (narrow) %v503_v24, 24 }
  0xf6   :  { %v496_v30 = vpop.f32.mrb[2].mxu0 }
  0xf7   :  { %v141_v31 = vpop.f32.mrb[3].mxu0 }
  0xf8   :  { %251 = vxpose.xlu1.b32.cont [2/4] (short) (narrow) %v493_v26, 40  ;;  %319 = vxpose.xlu0.b32.cont [3/4] (short) (narrow) %v241_v29, 24 }
  0xfc   :  { %252 = vxpose.xlu1.b32.cont [3/4] (short) (narrow) %v141_v31, 40  ;;  %320 = vxpose.xlu0.b32.end [4/4] (short) (narrow) %v506_v28, 24 }
 0x100   :  { %253 = vxpose.xlu1.b32.end [4/4] (short) (narrow) %v496_v30, 40 }
 0x122   :  { %304 = vperm.xlu1 %527, %v285_v32  }
 0x125   :  { %359 = vperm.xlu0 %526, %v350_v33  }
 0x170   :  { %v333_v41 = vpop.trf.xlu0 }
 0x171   :  { %v367_v56 = vadd.f32 %v355_v34, %v333_v41 }
 0x173   :  { %v389_v0 = vmax.f32 %v367_v56, 0.0 }
 0x174   :  { %v266_v40 = vpop.trf.xlu1  ;;  %v334_v43 = vpop.trf.xlu0 }
 0x175   :  { %v312_v57 = vadd.f32 %v290_v35, %v266_v40 }
 0x177   :  { %v377_v1 = vmax.f32 %v312_v57, 0.0 }
 0x178   :  { %v267_v42 = vpop.trf.xlu1  ;;  %v335_v46 = vpop.trf.xlu0 }
 0x179   :  { %v369_v48 = vadd.f32 %v365_v39, %v335_v46  ;;  %v313_v58 = vadd.f32 %v295_v36, %v267_v42 }
 0x17b   :  { %v378_v3 = vmax.f32 %v313_v58, 0.0 }
 0x17c   :  { %v268_v44 = vpop.trf.xlu1 }
 0x17d   :  { %v314_v59 = vadd.f32 %v300_v38, %v268_v44 }
 0x17f   :  { %v379_v4 = vmax.f32 %v314_v59, 0.0 }
 0x180   :  { %v269_v45 = vpop.trf.xlu1 }
 0x184   :  { %v270_v47 = vpop.trf.xlu1 }
 0x185   :  { %v316_v49 = vadd.f32 %v310_v37, %v270_v47 }
 0x187   :  { %v370_v50 = vadd.f32 %v369_v48, %v316_v49 }
 0x189   :  { %v464_v51 = vmul.f32 -1.442695, %v370_v50 }
 0x18b   :  { %528 = vpow2.f32 %v464_v51 }
 0x195   :  { %v529_v52 = vpop.eup %528 }
 0x196   :  { %v374_v53 = vadd.f32 1.0, %v529_v52 }
 0x198   :  { %530 = vrcp.f32 %v374_v53 }
 0x1a1   :  { %v305_v62 = vpop.permute.xlu1 %304 }
 0x1a2   :  { %v531_v63 = vpop.eup %530  ;;  %v315_v2 = vadd.f32 %v305_v62, %v269_v45 }
 0x1a3   :  { %v384_v5 = vrot.slane %v531_v63, %v383_v60  ;;  %v394_v6 = vrot.slane %v531_v63, %v393_v61 }
 0x1a4   :  { %v380_v7 = vmax.f32 %v315_v2, 0.0  ;;  %v360_v8 = vpop.permute.xlu0 %359 }
 0x1a5   :  { %v395_v9 = vmul.f32 %v394_v6, %v389_v0  ;;  %v385_v10 = vmul.f32 %v384_v5, %v377_v1  ;;  %v386_v11 = vmul.f32 %v384_v5, %v378_v3  ;;  %v387_v12 = vmul.f32 %v384_v5, %v379_v4 }
 0x1a6   :  { %v388_v13 = vmul.f32 %v384_v5, %v380_v7  ;;  %v368_v14 = vadd.f32 %v360_v8, %v334_v43 }
 0x1a7   :  { %426 = vrot.lane.b32.xlu1 %v395_v9, %s584_s3  ;;  %401 = vst.msk [vmem:[#allocation5] sm:$0xff] %vm152_vm0, %v395_v9  ;;  %397 = vst.msk [vmem:[%s760_s6] sm:$0xff] %vm152_vm0, %v385_v10 }
 0x1a8   :  { %398 = vst.msk [vmem:[%s760_s6 + $0x8] sm:$0xff] %vm152_vm0, %v386_v11  ;;  %399 = vst.msk [vmem:[%s760_s6 + $0x10] sm:$0xff] %vm152_vm0, %v387_v12  ;;  %v390_v15 = vmax.f32 %v368_v14, 0.0 }
 0x1a9   :  { %400 = vst.msk [vmem:[%s760_s6 + $0x18] sm:$0xff] %vm152_vm0, %v388_v13 }
 0x1aa   :  { %v396_v16 = vmul.f32 %v394_v6, %v390_v15 }
 0x1ac   :  { %402 = vst.msk [vmem:[#allocation5 + $0x8] sm:$0xff] %vm152_vm0, %v396_v16  ;;  %428 = vrot.lane.b32.xlu1 %v396_v16, %s584_s3 }
 0x1b0   :  { %407 = vrot.lane.b32.xlu1 %v385_v10, %s584_s3 }
 0x1b4   :  { %409 = vrot.lane.b32.xlu1 %v386_v11, %s584_s3 }
 0x1b8   :  { %411 = vrot.lane.b32.xlu1 %v387_v12, %s584_s3 }
 0x1bc   :  { %413 = vrot.lane.b32.xlu1 %v388_v13, %s584_s3 }
 0x219   :  { %v427_v17 = vpop.permute.xlu1 %426 }
 0x21a   :  { %433 = vst.msk [vmem:[#allocation5 + $0x10] sm:$0xff] %vm152_vm0, %v427_v17 }
 0x21e   :  { %v429_v18 = vpop.permute.xlu1 %428 }
 0x21f   :  { %434 = vst.msk [vmem:[#allocation5 + $0x18] sm:$0xff] %vm152_vm0, %v429_v18 }
 0x220   :  { %565 = shalt.err (!%p562_p12)
}
 0x221   :  { %s566_s15 = scalar_lea.hbm %s761_s7, 512 }
 0x222   :  { %p567_p13 = scmp.ne.s32.totalorder %s761_s7, %s566_s15  ;;  %p570_p0 = scmp.lt.u32.totalorder %s566_s15, %s761_s7 }
 0x224   :  { %p572_p1 = pnand %p570_p0, %p567_p13 }
 0x226   :  { %575 = shalt.err (!%p572_p1)
}
 0x227   :  { %448 = dma.vmem_to_hbm [thread:$0]  %s443_s9, 512, %s761_s7, [#allocation4], %s581_s11, %s581_s11, %s582_s12   ;;  %v408_v19 = vpop.permute.xlu1 %407 }
 0x228   :  { %465 = vst.msk [vmem:[%s760_s6 + $0x20] sm:$0xff] %vm152_vm0, %v408_v19 }
 0x22b   :  { %v410_v20 = vpop.permute.xlu1 %409 }
 0x22c   :  { %466 = vst.msk [vmem:[%s760_s6 + $0x28] sm:$0xff] %vm152_vm0, %v410_v20 }
 0x22f   :  { %v412_v21 = vpop.permute.xlu1 %411 }
 0x230   :  { %467 = vst.msk [vmem:[%s760_s6 + $0x30] sm:$0xff] %vm152_vm0, %v412_v21 }
 0x233   :  { %v414_v22 = vpop.permute.xlu1 %413 }
 0x234   :  { %468 = vst.msk [vmem:[%s760_s6 + $0x38] sm:$0xff] %vm152_vm0, %v414_v22 }
 0x235   :  { %578 = dma.done.wait [#allocation4], 512  }
 0x236   :  { %579 = vsyncadd [#allocation4], 4294966784 }
 0x237   :  { %454 = vsyncpa [#allocation3], 1 }
 0x238   :  { %455 = vsyncpa [#allocation4], 1 }

</bundles_post_ra>
